<compile_context>
chip_gen: v5e
topology: v5e:2x2
jax: 0.10.0
libtpu: 0.0.40
codegen_flags: <defaults>
</compile_context>

<pallas_src>
import functools

import numpy as np
import jax
import jax.numpy as jnp
from jax.experimental import pallas as pl
from jax.experimental.pallas import tpu as pltpu


def _round_up(x: int, m: int) -> int:
    return (x + m - 1) // m * m


def _lane_align(d: int) -> int:
    # 256-aligned operands fully feed the v6e/v7x 256x256 MXU when the dim is
    # large enough; 128 otherwise (exactly feeds the v5e 128x128 MXU).
    return _round_up(d, 256) if d >= 256 else _round_up(d, 128)


def _batch_tiling(B: int, block_b: int) -> tuple[int, int]:
    """Pick (TB, B_pad): TB multiple of 8, B_pad = TB * n_steps >= B."""
    B8 = _round_up(B, 8)
    tb0 = max(8, min(_round_up(block_b, 8), B8))
    n_steps = -(-B8 // tb0)
    # v7x megacore: make sure there are >= 2 grid steps so the "parallel"
    # batch axis actually shards across both TensorCores (no-op for tiny B).
    if n_steps == 1 and B8 >= 16:
        n_steps = 2
    tb = _round_up(-(-B8 // n_steps), 8)
    return tb, tb * n_steps


def mlp_kernel(x_ref, w1_ref, b1_ref, w2_ref, b2_ref, o_ref):
    # x arrives unpadded f32; cast to the MXU operand dtype in VMEM.
    x = x_ref[...].astype(w1_ref.dtype)
    # fc1: (TB, D_in) @ (D_in, H_p) on the MXU, f32 accumulate.
    h = jnp.dot(x, w1_ref[...], preferred_element_type=jnp.float32)
    # bias + ReLU in f32 on the VPU (b1 is a (1, H_p) lane-dense broadcast).
    h = jnp.maximum(h + b1_ref[...], 0.0)
    # fc2: (TB, H_p) @ (H_p, C) on the MXU, f32 accumulate.
    y = jnp.dot(h.astype(w2_ref.dtype), w2_ref[...],
                preferred_element_type=jnp.float32)
    o_ref[...] = (y + b2_ref[...]).astype(o_ref.dtype)


def prepare_params(w1, b1, w2, b2, mxu_dtype=jnp.bfloat16):
    """One-time weight prep (hoisted out of the per-call path).

    Only the hidden dim H is zero-padded / lane-aligned; D_in and C are left
    unpadded so x needs no pad pass and the output writeback is not inflated.
    Weights are pre-cast to the MXU operand dtype; biases stay f32.
    """
    D_in, H = w1.shape
    C = w2.shape[1]
    H_p = _lane_align(H)
    f32 = jnp.float32
    w1_p = jnp.zeros((D_in, H_p), mxu_dtype).at[:, :H].set(w1.astype(mxu_dtype))
    b1_p = jnp.zeros((1, H_p), f32).at[:, :H].set(b1.astype(f32).reshape(1, H))
    w2_p = jnp.zeros((H_p, C), mxu_dtype).at[:H, :].set(w2.astype(mxu_dtype))
    b2_p = b2.astype(f32).reshape(1, C)
    return w1_p, b1_p, w2_p, b2_p


def _buf_bytes(shape, dtype, n_buffers):
    sub = _round_up(shape[-2] if len(shape) > 1 else 1, 8)
    lane = _round_up(shape[-1], 128)
    return sub * lane * np.dtype(dtype).itemsize * n_buffers


@functools.partial(jax.jit, static_argnames=("block_b", "single_buffer_weights"))
def neural_network_forward(x, w1_p, b1_p, w2_p, b2_p, *,
                           block_b: int = 512,
                           single_buffer_weights: bool = True):
    """Pallas fc2(relu(fc1(x))) using params from prepare_params()."""
    B, D_in = x.shape
    H_p = w1_p.shape[1]
    C = w2_p.shape[1]
    TB, B_p = _batch_tiling(B, block_b)
    if B_p != B:
        x = jnp.pad(x, ((0, B_p - B), (0, 0)))  # batch-only pad, fuses under jit

    # Constant-index (VMEM-resident) blocks: request a single pipeline buffer.
    resident = (dict(pipeline_mode=pl.Buffered(1))
                if single_buffer_weights else {})
    w_bufs = 1 if single_buffer_weights else 2

    # Explicit VMEM budget from the actual buffer sizes (+ generous headroom).
    vmem = (_buf_bytes((TB, D_in), x.dtype, 2)
            + _buf_bytes((TB, C), x.dtype, 2)
            + _buf_bytes(w1_p.shape, w1_p.dtype, w_bufs)
            + _buf_bytes(b1_p.shape, b1_p.dtype, w_bufs)
            + _buf_bytes(w2_p.shape, w2_p.dtype, w_bufs)
            + _buf_bytes(b2_p.shape, b2_p.dtype, w_bufs))
    vmem_limit = int(min(2 * vmem + (4 << 20), 64 << 20))  # <= v7x per-TC VMEM

    out = pl.pallas_call(
        mlp_kernel,
        out_shape=jax.ShapeDtypeStruct((B_p, C), x.dtype),
        grid_spec=pl.GridSpec(
            grid=(B_p // TB,),
            in_specs=[
                # x tile moves per grid step; D_in kept unpadded (full dim).
                pl.BlockSpec((TB, D_in), lambda i: (i, 0)),
                # Weights/biases: constant index_map -> loaded once, resident.
                pl.BlockSpec((D_in, H_p), lambda i: (0, 0), **resident),
                pl.BlockSpec((1, H_p), lambda i: (0, 0), **resident),
                pl.BlockSpec((H_p, C), lambda i: (0, 0), **resident),
                pl.BlockSpec((1, C), lambda i: (0, 0), **resident),
            ],
            # Output last dim = actual C (full dim): no padded writeback,
            # no trailing column slice.
            out_specs=pl.BlockSpec((TB, C), lambda i: (i, 0)),
        ),
        compiler_params=pltpu.CompilerParams(
            dimension_semantics=("parallel",),  # megacore-shardable batch axis
            vmem_limit_bytes=vmem_limit),
    )(x, w1_p, b1_p, w2_p, b2_p)

    return out if B_p == B else out[:B]


def init_linear_params(key, in_features, out_features, dtype=jnp.float32):
    # Mimic torch.nn.Linear default init: U(-1/sqrt(fan_in), +1/sqrt(fan_in)).
    kw, kb = jax.random.split(key)
    bound = 1.0 / jnp.sqrt(jnp.array(in_features, dtype))
    # weight stored pre-transposed: (in_features, out_features)
    w = jax.random.uniform(kw, (in_features, out_features), dtype,
                           minval=-bound, maxval=bound)
    b = jax.random.uniform(kb, (out_features,), dtype,
                           minval=-bound, maxval=bound)
    return w, b


if __name__ == "__main__":
    # Small shapes consistent with the module: batch=8, input=32, hidden=64, classes=16
    batch, input_size, hidden_size, num_classes = 8, 32, 64, 16

    key = jax.random.PRNGKey(0)
    kx, k1, k2, k3 = jax.random.split(key, 4)

    x = jax.random.normal(kx, (batch, input_size), jnp.float32)
    w1, b1 = init_linear_params(k1, input_size, hidden_size)          # self.fc1
    w_out, b_out = init_linear_params(k2, hidden_size, num_classes)   # self.output (unused in forward)
    w2, b2 = init_linear_params(k3, hidden_size, num_classes)         # self.fc2

    # One-time weight padding / bf16 cast (hoisted out of the per-call path).
    params = jax.block_until_ready(prepare_params(w1, b1, w2, b2))

    try:
        out = jax.block_until_ready(neural_network_forward(x, *params))
    except Exception:
        # Fallback if pipeline_mode=pl.Buffered(1) is unsupported by this
        # jax/libtpu combo: default double-buffered resident weights (only a
        # few KiB extra VMEM at these sizes).
        out = jax.block_until_ready(
            neural_network_forward(x, *params, single_buffer_weights=False))

    # Reference check in plain JAX (f32); tolerance accounts for bf16 MXU operands.
    ref = jnp.maximum(x @ w1 + b1[None, :], 0.0) @ w2 + b2[None, :]
    assert out.shape == (batch, num_classes)
    assert jnp.allclose(out, ref, atol=2e-2, rtol=2e-2), \
        f"max abs err = {float(jnp.max(jnp.abs(out - ref)))}"

    print("KERNEL_OK")
</pallas_src>

<mosaic_0001>
module attributes {stable_mosaic.version = 11 : i64} {
  func.func @mlp_kernel(%arg0: i32, %arg1: memref<8x32xf32, #tpu.memory_space<vmem>>, %arg2: memref<32x128xbf16, #tpu.memory_space<vmem>>, %arg3: memref<1x128xf32, #tpu.memory_space<vmem>>, %arg4: memref<128x16xbf16, #tpu.memory_space<vmem>>, %arg5: memref<1x16xf32, #tpu.memory_space<vmem>>, %arg6: memref<8x16xf32, #tpu.memory_space<vmem>>) attributes {dimension_semantics = [#tpu.dimension_semantics<parallel>], iteration_bounds = array<i64: 1>, scalar_prefetch = 0 : i64, scratch_operands = 0 : i64, tpu.core_type = #tpu.core_type<tc>, window_params = [{transform_indices = @transform_0, window_bounds = array<i64: 8, 32>}, {pipeline_mode = #tpu.pipeline_mode<synchronous>, transform_indices = @transform_1, window_bounds = array<i64: 32, 128>}, {pipeline_mode = #tpu.pipeline_mode<synchronous>, transform_indices = @transform_2, window_bounds = array<i64: 1, 128>}, {pipeline_mode = #tpu.pipeline_mode<synchronous>, transform_indices = @transform_3, window_bounds = array<i64: 128, 16>}, {pipeline_mode = #tpu.pipeline_mode<synchronous>, transform_indices = @transform_4, window_bounds = array<i64: 1, 16>}, {transform_indices = @transform_5, window_bounds = array<i64: 8, 16>}]} {
    %c0 = arith.constant 0 : index
    %c0_0 = arith.constant 0 : index
    %0 = vector.load %arg1[%c0, %c0_0] : memref<8x32xf32, #tpu.memory_space<vmem>>, vector<8x32xf32>
    %1 = arith.truncf %0 : vector<8x32xf32> to vector<8x32xbf16>
    %c0_1 = arith.constant 0 : index
    %c0_2 = arith.constant 0 : index
    %2 = vector.load %arg2[%c0_1, %c0_2] : memref<32x128xbf16, #tpu.memory_space<vmem>>, vector<32x128xbf16>
    %cst = arith.constant dense<0.000000e+00> : vector<8x128xf32>
    %3 = tpu.matmul %1, %2, %cst {dimension_numbers = #tpu.dot_dimension_numbers<[1], [0], [0], [1], [0, 0, 1, 1], [], []>} : vector<8x32xbf16>, vector<32x128xbf16>, vector<8x128xf32> -> vector<8x128xf32>
    %c0_3 = arith.constant 0 : index
    %c0_4 = arith.constant 0 : index
    %4 = vector.load %arg3[%c0_3, %c0_4] : memref<1x128xf32, #tpu.memory_space<vmem>>, vector<1x128xf32>
    %5 = vector.broadcast %4 : vector<1x128xf32> to vector<8x128xf32>
    %6 = arith.addf %3, %5 : vector<8x128xf32>
    %cst_5 = arith.constant 0.000000e+00 : f32
    %7 = vector.broadcast %cst_5 : f32 to vector<8x128xf32>
    %8 = arith.maximumf %6, %7 : vector<8x128xf32>
    %9 = arith.truncf %8 : vector<8x128xf32> to vector<8x128xbf16>
    %c0_6 = arith.constant 0 : index
    %c0_7 = arith.constant 0 : index
    %10 = vector.load %arg4[%c0_6, %c0_7] : memref<128x16xbf16, #tpu.memory_space<vmem>>, vector<128x16xbf16>
    %cst_8 = arith.constant dense<0.000000e+00> : vector<8x16xf32>
    %11 = tpu.matmul %9, %10, %cst_8 {dimension_numbers = #tpu.dot_dimension_numbers<[1], [0], [0], [1], [0, 0, 1, 1], [], []>} : vector<8x128xbf16>, vector<128x16xbf16>, vector<8x16xf32> -> vector<8x16xf32>
    %c0_9 = arith.constant 0 : index
    %c0_10 = arith.constant 0 : index
    %12 = vector.load %arg5[%c0_9, %c0_10] : memref<1x16xf32, #tpu.memory_space<vmem>>, vector<1x16xf32>
    %13 = vector.broadcast %12 : vector<1x16xf32> to vector<8x16xf32>
    %14 = arith.addf %11, %13 : vector<8x16xf32>
    %c0_11 = arith.constant 0 : index
    %c0_12 = arith.constant 0 : index
    %15 = vector.load %arg6[%c0_11, %c0_12] : memref<8x16xf32, #tpu.memory_space<vmem>>, vector<8x16xf32>
    tpu.vector_store %arg6[%c0_11, %c0_12], %14 {strides = array<i32>} : memref<8x16xf32, #tpu.memory_space<vmem>>, vector<8x16xf32>,
    return
  }
  func.func @transform_0(%arg0: i32) -> (i32, i32) {
    %c0_i32 = arith.constant 0 : i32
    %c0_i32_0 = arith.constant 0 : i32
    return %arg0, %c0_i32 : i32, i32
  }
  func.func @transform_1(%arg0: i32) -> (i32, i32) {
    %c0_i32 = arith.constant 0 : i32
    %c0_i32_0 = arith.constant 0 : i32
    %c0_i32_1 = arith.constant 0 : i32
    return %c0_i32, %c0_i32_0 : i32, i32
  }
  func.func @transform_2(%arg0: i32) -> (i32, i32) {
    %c0_i32 = arith.constant 0 : i32
    %c0_i32_0 = arith.constant 0 : i32
    %c0_i32_1 = arith.constant 0 : i32
    return %c0_i32, %c0_i32_0 : i32, i32
  }
  func.func @transform_3(%arg0: i32) -> (i32, i32) {
    %c0_i32 = arith.constant 0 : i32
    %c0_i32_0 = arith.constant 0 : i32
    %c0_i32_1 = arith.constant 0 : i32
    return %c0_i32, %c0_i32_0 : i32, i32
  }
  func.func @transform_4(%arg0: i32) -> (i32, i32) {
    %c0_i32 = arith.constant 0 : i32
    %c0_i32_0 = arith.constant 0 : i32
    %c0_i32_1 = arith.constant 0 : i32
    return %c0_i32, %c0_i32_0 : i32, i32
  }
  func.func @transform_5(%arg0: i32) -> (i32, i32) {
    %c0_i32 = arith.constant 0 : i32
    %c0_i32_0 = arith.constant 0 : i32
    return %arg0, %c0_i32 : i32, i32
  }
}

module attributes {stable_mosaic.version = 11 : i64} {
  func.func @mlp_kernel(%arg0: i32, %arg1: memref<8x32xf32, #tpu.memory_space<vmem>>, %arg2: memref<32x128xbf16, #tpu.memory_space<vmem>>, %arg3: memref<1x128xf32, #tpu.memory_space<vmem>>, %arg4: memref<128x16xbf16, #tpu.memory_space<vmem>>, %arg5: memref<1x16xf32, #tpu.memory_space<vmem>>, %arg6: memref<8x16xf32, #tpu.memory_space<vmem>>) attributes {dimension_semantics = [#tpu.dimension_semantics<parallel>], iteration_bounds = array<i64: 1>, scalar_prefetch = 0 : i64, scratch_operands = 0 : i64, tpu.core_type = #tpu.core_type<tc>, window_params = [{transform_indices = @transform_0, window_bounds = array<i64: 8, 32>}, {pipeline_mode = #tpu.pipeline_mode<synchronous>, transform_indices = @transform_1, window_bounds = array<i64: 32, 128>}, {pipeline_mode = #tpu.pipeline_mode<synchronous>, transform_indices = @transform_2, window_bounds = array<i64: 1, 128>}, {pipeline_mode = #tpu.pipeline_mode<synchronous>, transform_indices = @transform_3, window_bounds = array<i64: 128, 16>}, {pipeline_mode = #tpu.pipeline_mode<synchronous>, transform_indices = @transform_4, window_bounds = array<i64: 1, 16>}, {transform_indices = @transform_5, window_bounds = array<i64: 8, 16>}]} {
    %c0 = arith.constant 0 : index
    %c0_0 = arith.constant 0 : index
    %0 = vector.load %arg1[%c0, %c0_0] : memref<8x32xf32, #tpu.memory_space<vmem>>, vector<8x32xf32>
    %1 = arith.truncf %0 : vector<8x32xf32> to vector<8x32xbf16>
    %c0_1 = arith.constant 0 : index
    %c0_2 = arith.constant 0 : index
    %2 = vector.load %arg2[%c0_1, %c0_2] : memref<32x128xbf16, #tpu.memory_space<vmem>>, vector<32x128xbf16>
    %cst = arith.constant dense<0.000000e+00> : vector<8x128xf32>
    %3 = tpu.matmul %1, %2, %cst {dimension_numbers = #tpu.dot_dimension_numbers<[1], [0], [0], [1], [0, 0, 1, 1], [], []>} : vector<8x32xbf16>, vector<32x128xbf16>, vector<8x128xf32> -> vector<8x128xf32>
    %c0_3 = arith.constant 0 : index
    %c0_4 = arith.constant 0 : index
    %4 = vector.load %arg3[%c0_3, %c0_4] : memref<1x128xf32, #tpu.memory_space<vmem>>, vector<1x128xf32>
    %5 = vector.broadcast %4 : vector<1x128xf32> to vector<8x128xf32>
    %6 = arith.addf %3, %5 : vector<8x128xf32>
    %cst_5 = arith.constant 0.000000e+00 : f32
    %7 = vector.broadcast %cst_5 : f32 to vector<8x128xf32>
    %8 = arith.maximumf %6, %7 : vector<8x128xf32>
    %9 = arith.truncf %8 : vector<8x128xf32> to vector<8x128xbf16>
    %c0_6 = arith.constant 0 : index
    %c0_7 = arith.constant 0 : index
    %10 = vector.load %arg4[%c0_6, %c0_7] : memref<128x16xbf16, #tpu.memory_space<vmem>>, vector<128x16xbf16>
    %cst_8 = arith.constant dense<0.000000e+00> : vector<8x16xf32>
    %11 = tpu.matmul %9, %10, %cst_8 {dimension_numbers = #tpu.dot_dimension_numbers<[1], [0], [0], [1], [0, 0, 1, 1], [], []>} : vector<8x128xbf16>, vector<128x16xbf16>, vector<8x16xf32> -> vector<8x16xf32>
    %c0_9 = arith.constant 0 : index
    %c0_10 = arith.constant 0 : index
    %12 = vector.load %arg5[%c0_9, %c0_10] : memref<1x16xf32, #tpu.memory_space<vmem>>, vector<1x16xf32>
    %13 = vector.broadcast %12 : vector<1x16xf32> to vector<8x16xf32>
    %14 = arith.addf %11, %13 : vector<8x16xf32>
    %c0_11 = arith.constant 0 : index
    %c0_12 = arith.constant 0 : index
    %15 = vector.load %arg6[%c0_11, %c0_12] : memref<8x16xf32, #tpu.memory_space<vmem>>, vector<8x16xf32>
    tpu.vector_store %arg6[%c0_11, %c0_12], %14 {strides = array<i32>} : memref<8x16xf32, #tpu.memory_space<vmem>>, vector<8x16xf32>,
    return
  }
  func.func @transform_0(%arg0: i32) -> (i32, i32) {
    %c0_i32 = arith.constant 0 : i32
    %c0_i32_0 = arith.constant 0 : i32
    return %arg0, %c0_i32 : i32, i32
  }
  func.func @transform_1(%arg0: i32) -> (i32, i32) {
    %c0_i32 = arith.constant 0 : i32
    %c0_i32_0 = arith.constant 0 : i32
    %c0_i32_1 = arith.constant 0 : i32
    return %c0_i32, %c0_i32_0 : i32, i32
  }
  func.func @transform_2(%arg0: i32) -> (i32, i32) {
    %c0_i32 = arith.constant 0 : i32
    %c0_i32_0 = arith.constant 0 : i32
    %c0_i32_1 = arith.constant 0 : i32
    return %c0_i32, %c0_i32_0 : i32, i32
  }
  func.func @transform_3(%arg0: i32) -> (i32, i32) {
    %c0_i32 = arith.constant 0 : i32
    %c0_i32_0 = arith.constant 0 : i32
    %c0_i32_1 = arith.constant 0 : i32
    return %c0_i32, %c0_i32_0 : i32, i32
  }
  func.func @transform_4(%arg0: i32) -> (i32, i32) {
    %c0_i32 = arith.constant 0 : i32
    %c0_i32_0 = arith.constant 0 : i32
    %c0_i32_1 = arith.constant 0 : i32
    return %c0_i32, %c0_i32_0 : i32, i32
  }
  func.func @transform_5(%arg0: i32) -> (i32, i32) {
    %c0_i32 = arith.constant 0 : i32
    %c0_i32_0 = arith.constant 0 : i32
    return %arg0, %c0_i32 : i32, i32
  }
}

</mosaic_0001>

<bundles_post_ra>
// kernel: neural_network_forward.1
= control target key start
LH: loop header
LB: loop body
LE: loop exit
PB: predicated region body
PF: predicated region fallthrough
CT: control target
= control target key end

     0   :  { %s315_s0 = inlined_call_operand.vmem [shape: f32[8,32], index: 0, kind: input, shape index: {}]   ;;  %s316_s1 = inlined_call_operand.vmem [shape: bf16[32,128], index: 1, kind: input, shape index: {}]   ;;  %s317_s2 = inlined_call_operand.vmem [shape: f32[1,128], index: 2, kind: input, shape index: {}]   ;;  %s318_s3 = inlined_call_operand.vmem [shape: bf16[128,16], index: 3, kind: input, shape index: {}]   ;;  %s319_s4 = inlined_call_operand.vmem [shape: f32[1,16], index: 4, kind: input, shape index: {}]   ;;  %s320_s5 = inlined_call_operand.hbm [shape: f32[8,16], index: 5, kind: output, shape index: {}]  }
   0x1   :  { %v204_v0 = vld [vmem:[%s316_s1 + $0x8] sm:$0xff]  ;;  %v212_v1 = vld [vmem:[%s318_s3 + $0x38] sm:$0xff]  ;;  %v203_v2 = vld [vmem:[%s316_s1] sm:$0xff] }
   0x2   :  { %54 = vmatpush.bf16.msra.mxu0 %v204_v0  ;;  %v22_v3 = vld [vmem:[%s315_s0] sm:$0xff]  ;;  %131 = vmatpush.bf16.msra.mxu1 %v212_v1  ;;  %v211_v4 = vld [vmem:[%s318_s3 + $0x30] sm:$0xff] }
   0x3   :  { %10 = vsyncpa [#allocation3], 0  ;;  %v23_v5 = vpack.c.bf16 %v22_v3, %v22_v3  ;;  %vm44_vm0 = vcmask 261120   ;;  %v210_v6 = vld [vmem:[%s318_s3 + $0x28] sm:$0xff]  ;;  %v209_v7 = vld [vmem:[%s318_s3 + $0x20] sm:$0xff]  ;;  %s242_s17 = smov [#allocation2]  }
   0x4   :  { %v208_v8 = vld [vmem:[%s318_s3 + $0x18] sm:$0xff]  ;;  %v207_v9 = vld [vmem:[%s318_s3 + $0x10] sm:$0xff]  ;;  %v206_v10 = vld [vmem:[%s318_s3 + $0x8] sm:$0xff]  ;;  %s151_s18 = sshll.u32 %s242_s17, 4  ;;  %vm144_vm1 = vcmask 130048   ;;  %s152_s18 = int_to_ptr.vmem [resolvable:$true] %s151_s18 }
   0x5   :  { %v205_v11 = vld [vmem:[%s318_s3] sm:$0xff]  ;;  %s153_s3 = sshll.u32 %s320_s5, 4  ;;  %s154_s3 = int_to_ptr.hbm [resolvable:$true] %s153_s3 }
   0x6   :  { %55 = vmatpush.bf16.msra.mxu0 %v203_v2  ;;  %132 = vmatpush.bf16.msra.mxu1 %v211_v4  ;;  %v214_v12 = vld [vmem:[%s317_s2] ss:$0 sm:$0xff] }
   0x7   :  { %v215_v18 = vld [vmem:[%s319_s4] ss:$0 sm:$0xff] }
   0x9   :  { %170 = vmatmul.msk.bf16.vlgmr.msra.gmra.mxu0 %vm44_vm0, %v23_v5 }
   0xa   :  { %133 = vmatpush.bf16.msra.mxu1 %v210_v6 }
   0xe   :  { %134 = vmatpush.bf16.msra.mxu1 %v209_v7 }
  0x12   :  { %135 = vmatpush.bf16.msra.mxu1 %v208_v8 }
  0x16   :  { %136 = vmatpush.bf16.msra.mxu1 %v207_v9 }
  0x1a   :  { %137 = vmatpush.bf16.msra.mxu1 %v206_v10 }
  0x1e   :  { %138 = vmatpush.bf16.msra.mxu1 %v205_v11 }
  0x86   :  { %v57_v13 = vpop.f32.mrf.mxu0 }
  0x87   :  { %v58_v14 = vadd.f32 %v214_v12, %v57_v13 }
  0x89   :  { %v61_v15 = vmax.f32 %v58_v14, 0.0 }
  0x8b   :  { %v62_v16 = vpack.c.bf16 %v61_v15, %v61_v15 }
  0x8d   :  { %139 = vmatmul.bf16.vlgmr.msra.gmra.mxu1 %v62_v16 }
  0x8e   :  { %v59_v17 = vpop.f32.mrf.mxu0 }
 0x10a   :  { %v140_v19 = vpop.f32.mrf.mxu1 }
 0x10b   :  { %v141_v20 = vadd.f32 %v215_v18, %v140_v19 }
 0x10d   :  { %145 = vst.msk [vmem:[#allocation2] sm:$0xff] %vm144_vm1, %v141_v20 }
 0x10e   :  { %156 = dma.vmem_to_hbm [thread:$0]  %s152_s18, 128, %s154_s3, [#allocation3]  }
 0x112   :  { %v142_v21 = vpop.f32.mrf.mxu1 }
 0x113   :  { %240 = dma.done.wait [#allocation3], 128  }
 0x114   :  { %241 = vsyncadd [#allocation3], 4294967168 }
 0x115   :  { %161 = vsyncpa [#allocation3], 1 }

// kernel: neural_network_forward.1
= control target key start
LH: loop header
LB: loop body
LE: loop exit
PB: predicated region body
PF: predicated region fallthrough
CT: control target
= control target key end

     0   :  { %s315_s0 = inlined_call_operand.vmem [shape: f32[8,32], index: 0, kind: input, shape index: {}]   ;;  %s316_s1 = inlined_call_operand.vmem [shape: bf16[32,128], index: 1, kind: input, shape index: {}]   ;;  %s317_s2 = inlined_call_operand.vmem [shape: f32[1,128], index: 2, kind: input, shape index: {}]   ;;  %s318_s3 = inlined_call_operand.vmem [shape: bf16[128,16], index: 3, kind: input, shape index: {}]   ;;  %s319_s4 = inlined_call_operand.vmem [shape: f32[1,16], index: 4, kind: input, shape index: {}]   ;;  %s320_s5 = inlined_call_operand.hbm [shape: f32[8,16], index: 5, kind: output, shape index: {}]  }
   0x1   :  { %v204_v0 = vld [vmem:[%s316_s1 + $0x8] sm:$0xff]  ;;  %v212_v1 = vld [vmem:[%s318_s3 + $0x38] sm:$0xff]  ;;  %v203_v2 = vld [vmem:[%s316_s1] sm:$0xff] }
   0x2   :  { %54 = vmatpush.bf16.msra.mxu0 %v204_v0  ;;  %v22_v3 = vld [vmem:[%s315_s0] sm:$0xff]  ;;  %131 = vmatpush.bf16.msra.mxu1 %v212_v1  ;;  %v211_v4 = vld [vmem:[%s318_s3 + $0x30] sm:$0xff] }
   0x3   :  { %10 = vsyncpa [#allocation3], 0  ;;  %v23_v5 = vpack.c.bf16 %v22_v3, %v22_v3  ;;  %vm44_vm0 = vcmask 261120   ;;  %v210_v6 = vld [vmem:[%s318_s3 + $0x28] sm:$0xff]  ;;  %v209_v7 = vld [vmem:[%s318_s3 + $0x20] sm:$0xff]  ;;  %s242_s17 = smov [#allocation2]  }
   0x4   :  { %v208_v8 = vld [vmem:[%s318_s3 + $0x18] sm:$0xff]  ;;  %v207_v9 = vld [vmem:[%s318_s3 + $0x10] sm:$0xff]  ;;  %v206_v10 = vld [vmem:[%s318_s3 + $0x8] sm:$0xff]  ;;  %s151_s18 = sshll.u32 %s242_s17, 4  ;;  %vm144_vm1 = vcmask 130048   ;;  %s152_s18 = int_to_ptr.vmem [resolvable:$true] %s151_s18 }
   0x5   :  { %v205_v11 = vld [vmem:[%s318_s3] sm:$0xff]  ;;  %s153_s3 = sshll.u32 %s320_s5, 4  ;;  %s154_s3 = int_to_ptr.hbm [resolvable:$true] %s153_s3 }
   0x6   :  { %55 = vmatpush.bf16.msra.mxu0 %v203_v2  ;;  %132 = vmatpush.bf16.msra.mxu1 %v211_v4  ;;  %v214_v12 = vld [vmem:[%s317_s2] ss:$0 sm:$0xff] }
   0x7   :  { %v215_v18 = vld [vmem:[%s319_s4] ss:$0 sm:$0xff] }
   0x9   :  { %170 = vmatmul.msk.bf16.vlgmr.msra.gmra.mxu0 %vm44_vm0, %v23_v5 }
   0xa   :  { %133 = vmatpush.bf16.msra.mxu1 %v210_v6 }
   0xe   :  { %134 = vmatpush.bf16.msra.mxu1 %v209_v7 }
  0x12   :  { %135 = vmatpush.bf16.msra.mxu1 %v208_v8 }
  0x16   :  { %136 = vmatpush.bf16.msra.mxu1 %v207_v9 }
  0x1a   :  { %137 = vmatpush.bf16.msra.mxu1 %v206_v10 }
  0x1e   :  { %138 = vmatpush.bf16.msra.mxu1 %v205_v11 }
  0x86   :  { %v57_v13 = vpop.f32.mrf.mxu0 }
  0x87   :  { %v58_v14 = vadd.f32 %v214_v12, %v57_v13 }
  0x89   :  { %v61_v15 = vmax.f32 %v58_v14, 0.0 }
  0x8b   :  { %v62_v16 = vpack.c.bf16 %v61_v15, %v61_v15 }
  0x8d   :  { %139 = vmatmul.bf16.vlgmr.msra.gmra.mxu1 %v62_v16 }
  0x8e   :  { %v59_v17 = vpop.f32.mrf.mxu0 }
 0x10a   :  { %v140_v19 = vpop.f32.mrf.mxu1 }
 0x10b   :  { %v141_v20 = vadd.f32 %v215_v18, %v140_v19 }
 0x10d   :  { %145 = vst.msk [vmem:[#allocation2] sm:$0xff] %vm144_vm1, %v141_v20 }
 0x10e   :  { %156 = dma.vmem_to_hbm [thread:$0]  %s152_s18, 128, %s154_s3, [#allocation3]  }
 0x112   :  { %v142_v21 = vpop.f32.mrf.mxu1 }
 0x113   :  { %240 = dma.done.wait [#allocation3], 128  }
 0x114   :  { %241 = vsyncadd [#allocation3], 4294967168 }
 0x115   :  { %161 = vsyncpa [#allocation3], 1 }

</bundles_post_ra>
